<compile_context>
chip_gen: v6e
topology: v6e:2x2x1
jax: 0.10.0
libtpu: 0.0.40
codegen_flags: <defaults>
</compile_context>

<pallas_src>
import functools

import jax
import jax.numpy as jnp
from jax.experimental import pallas as pl
from jax.experimental.pallas import tpu as pltpu


def _conv1x1_scatter_kernel(x_ref, w_ref, b_ref, s_ref, other_ref,
                            stride2_ref, o_ref, *, nb):
    # Ref shapes (per grid step, nb = batch elements per step):
    #   x_ref:       (nb, CIN, H*W)    interior pixels, pixels on lanes
    #   w_ref:       (COUT, CIN)
    #   b_ref:       (COUT, 1)         broadcasts along lanes
    #   s_ref:       (H*W, HP*WP)      constant one-hot scatter matrix
    #   other_ref:   (nb, COUT, HP*WP)
    #   stride2_ref: (nb, COUT, HP*WP)
    #   o_ref:       (nb, COUT, HP*WP)
    w = w_ref[...]
    s = s_ref[...]
    bias = b_ref[...]  # (COUT, 1) -> broadcasts over the lane (pixel) axis

    # nb is a small compile-time constant; a static unrolled loop of 2D MXU
    # matmuls keeps everything lane-dense and avoids batched-dot lowering.
    for i in range(nb):
        # 1x1 conv == channel matmul: (COUT, CIN) @ (CIN, H*W)
        conv = jnp.dot(w, x_ref[i], preferred_element_type=jnp.float32)
        # Interior -> padded-pixel scatter on the MXU: (COUT, H*W) @ (H*W, M)
        conv_pad = jnp.dot(conv, s, preferred_element_type=jnp.float32)
        # Single lane-dense elementwise tail + store (no RMW).
        o_ref[i] = conv_pad + bias + 2.0 * other_ref[i] + stride2_ref[i]


def _pick_batch_block(n, per_batch_bytes, limit_bytes=2 << 20):
    """Largest divisor of n whose per-step working set stays <= ~2 MiB."""
    nb = 1
    for cand in range(1, n + 1):
        if n % cand == 0 and cand * per_batch_bytes <= limit_bytes:
            nb = cand
    return nb


def model_forward(x1, weight, bias, other, stride2):
    """x1: (N, Cin, H, W) f32.  Returns (N, Cout, H+2, W+2) f32."""
    N, CIN, H, W = x1.shape
    COUT = weight.shape[0]
    HP, WP = H + 2, W + 2
    HW = H * W
    M = HP * WP

    # Wrapper does ONLY zero-copy reshapes (no pad / no transpose).
    x3d = x1.reshape(N, CIN, HW)
    w2d = weight.reshape(COUT, CIN)
    b2d = bias.reshape(COUT, 1)
    other3d = other.reshape(N, COUT, M)
    stride3d = stride2.reshape(N, COUT, M)

    # Constant one-hot scatter matrix: interior pixel p=(h,w) -> padded pixel
    # (h+1, w+1).  Border columns are all-zero => conv contributes nothing.
    p = jnp.arange(HW)
    dst = (p // W + 1) * WP + (p % W + 1)
    scat = jax.nn.one_hot(dst, M, dtype=jnp.float32)  # (HW, M)

    per_batch_bytes = 4 * (CIN * HW + 3 * COUT * M)
    nb = _pick_batch_block(N, per_batch_bytes)
    grid = (N // nb,)

    kernel = functools.partial(_conv1x1_scatter_kernel, nb=nb)

    cost = pl.CostEstimate(
        flops=(2 * N * COUT * CIN * HW          # channel matmul
               + 2 * N * COUT * HW * M          # scatter matmul
               + 3 * N * COUT * M),             # elementwise tail
        transcendentals=0,
        bytes_accessed=4 * (N * (CIN * HW + 3 * COUT * M)
                            + COUT * CIN + COUT + HW * M),
    )

    out3d = pl.pallas_call(
        kernel,
        out_shape=jax.ShapeDtypeStruct((N, COUT, M), jnp.float32),
        grid_spec=pl.GridSpec(
            grid=grid,
            in_specs=[
                pl.BlockSpec((nb, CIN, HW), lambda g: (g, 0, 0)),
                pl.BlockSpec((COUT, CIN), lambda g: (0, 0)),
                pl.BlockSpec((COUT, 1), lambda g: (0, 0)),
                pl.BlockSpec((HW, M), lambda g: (0, 0)),
                pl.BlockSpec((nb, COUT, M), lambda g: (g, 0, 0)),
                pl.BlockSpec((nb, COUT, M), lambda g: (g, 0, 0)),
            ],
            out_specs=pl.BlockSpec((nb, COUT, M), lambda g: (g, 0, 0)),
        ),
        compiler_params=pltpu.CompilerParams(
            dimension_semantics=("parallel",),
        ),
        cost_estimate=cost,
    )(x3d, w2d, b2d, scat, other3d, stride3d)

    return out3d.reshape(N, COUT, HP, WP)


def reference_forward(x1, weight, bias, other, stride2):
    """Pure-JAX reference (lax conv) for a sanity check."""
    v1 = jax.lax.conv_general_dilated(
        x1, weight, window_strides=(1, 1), padding=((1, 1), (1, 1)),
        dimension_numbers=("NCHW", "OIHW", "NCHW"),
    ) + bias.reshape(1, -1, 1, 1)
    return v1 + other + other + stride2


if __name__ == "__main__":
    # Cin=23 / Cout=8 fixed by the conv; spatial reduced from 64x64 to 16x16;
    # small batch of 2 to exercise the batch-blocked grid.
    N, CIN, H, W = 2, 23, 16, 16
    COUT = 8
    HP, WP = H + 2, W + 2

    key = jax.random.PRNGKey(0)
    k_x, k_w, k_b, k_other, k_stride = jax.random.split(key, 5)

    x1 = jax.random.normal(k_x, (N, CIN, H, W), dtype=jnp.float32)
    fan_in = CIN  # 1x1 kernel
    bound = 1.0 / (fan_in ** 0.5)
    weight = jax.random.uniform(k_w, (COUT, CIN, 1, 1), jnp.float32, -bound, bound)
    bias = jax.random.uniform(k_b, (COUT,), jnp.float32, -bound, bound)
    # tensors the module would draw with torch.randn(v1.shape)
    other = jax.random.normal(k_other, (N, COUT, HP, WP), dtype=jnp.float32)
    stride2 = jax.random.normal(k_stride, (N, COUT, HP, WP), dtype=jnp.float32)

    out = jax.block_until_ready(model_forward(x1, weight, bias, other, stride2))
    ref = reference_forward(x1, weight, bias, other, stride2)

    assert out.shape == (N, COUT, HP, WP), out.shape
    assert jnp.allclose(out, ref, atol=1e-4, rtol=1e-4), "mismatch vs reference"

    print("KERNEL_OK")
</pallas_src>

<mosaic_0001>
module attributes {stable_mosaic.version = 11 : i64} {
  func.func @_conv1x1_scatter_kernel(%arg0: i32, %arg1: memref<2x23x256xf32, #tpu.memory_space<vmem>>, %arg2: memref<8x23xf32, #tpu.memory_space<vmem>>, %arg3: memref<8x1xf32, #tpu.memory_space<vmem>>, %arg4: memref<256x324xf32, #tpu.memory_space<vmem>>, %arg5: memref<2x8x324xf32, #tpu.memory_space<vmem>>, %arg6: memref<2x8x324xf32, #tpu.memory_space<vmem>>, %arg7: memref<2x8x324xf32, #tpu.memory_space<vmem>>) attributes {dimension_semantics = [#tpu.dimension_semantics<parallel>], iteration_bounds = array<i64: 1>, scalar_prefetch = 0 : i64, scratch_operands = 0 : i64, tpu.core_type = #tpu.core_type<tc>, window_params = [{transform_indices = @transform_0, window_bounds = array<i64: 2, 23, 256>}, {pipeline_mode = #tpu.pipeline_mode<synchronous>, transform_indices = @transform_1, window_bounds = array<i64: 8, 23>}, {pipeline_mode = #tpu.pipeline_mode<synchronous>, transform_indices = @transform_2, window_bounds = array<i64: 8, 1>}, {pipeline_mode = #tpu.pipeline_mode<synchronous>, transform_indices = @transform_3, window_bounds = array<i64: 256, 324>}, {transform_indices = @transform_4, window_bounds = array<i64: 2, 8, 324>}, {transform_indices = @transform_5, window_bounds = array<i64: 2, 8, 324>}, {transform_indices = @transform_6, window_bounds = array<i64: 2, 8, 324>}]} {
    %c0 = arith.constant 0 : index
    %c0_0 = arith.constant 0 : index
    %0 = vector.load %arg2[%c0, %c0_0] : memref<8x23xf32, #tpu.memory_space<vmem>>, vector<8x23xf32>
    %c0_1 = arith.constant 0 : index
    %c0_2 = arith.constant 0 : index
    %1 = vector.load %arg4[%c0_1, %c0_2] : memref<256x324xf32, #tpu.memory_space<vmem>>, vector<256x324xf32>
    %c0_3 = arith.constant 0 : index
    %c0_4 = arith.constant 0 : index
    %2 = vector.load %arg3[%c0_3, %c0_4] : memref<8x1xf32, #tpu.memory_space<vmem>>, vector<8x1xf32>
    %c0_5 = arith.constant 0 : index
    %c0_6 = arith.constant 0 : index
    %c0_7 = arith.constant 0 : index
    %3 = vector.load %arg1[%c0_5, %c0_6, %c0_7] : memref<2x23x256xf32, #tpu.memory_space<vmem>>, vector<1x23x256xf32>
    %4 = vector.shape_cast %3 : vector<1x23x256xf32> to vector<23x256xf32>
    %cst = arith.constant dense<0.000000e+00> : vector<8x256xf32>
    %5 = tpu.matmul %0, %4, %cst {dimension_numbers = #tpu.dot_dimension_numbers<[1], [0], [0], [1], [0, 0, 1, 1], [], []>} : vector<8x23xf32>, vector<23x256xf32>, vector<8x256xf32> -> vector<8x256xf32>
    %cst_8 = arith.constant dense<0.000000e+00> : vector<8x324xf32>
    %6 = tpu.matmul %5, %1, %cst_8 {dimension_numbers = #tpu.dot_dimension_numbers<[1], [0], [0], [1], [0, 0, 1, 1], [], []>} : vector<8x256xf32>, vector<256x324xf32>, vector<8x324xf32> -> vector<8x324xf32>
    %7 = vector.broadcast %2 : vector<8x1xf32> to vector<8x324xf32>
    %8 = arith.addf %6, %7 : vector<8x324xf32>
    %c0_9 = arith.constant 0 : index
    %c0_10 = arith.constant 0 : index
    %c0_11 = arith.constant 0 : index
    %9 = vector.load %arg5[%c0_9, %c0_10, %c0_11] : memref<2x8x324xf32, #tpu.memory_space<vmem>>, vector<1x8x324xf32>
    %10 = vector.shape_cast %9 : vector<1x8x324xf32> to vector<8x324xf32>
    %cst_12 = arith.constant 2.000000e+00 : f32
    %11 = vector.broadcast %cst_12 : f32 to vector<8x324xf32>
    %12 = arith.mulf %11, %10 : vector<8x324xf32>
    %13 = arith.addf %8, %12 : vector<8x324xf32>
    %c0_13 = arith.constant 0 : index
    %c0_14 = arith.constant 0 : index
    %c0_15 = arith.constant 0 : index
    %14 = vector.load %arg6[%c0_13, %c0_14, %c0_15] : memref<2x8x324xf32, #tpu.memory_space<vmem>>, vector<1x8x324xf32>
    %15 = vector.shape_cast %14 : vector<1x8x324xf32> to vector<8x324xf32>
    %16 = arith.addf %13, %15 : vector<8x324xf32>
    %c0_16 = arith.constant 0 : index
    %c0_17 = arith.constant 0 : index
    %c0_18 = arith.constant 0 : index
    %17 = vector.load %arg7[%c0_16, %c0_17, %c0_18] : memref<2x8x324xf32, #tpu.memory_space<vmem>>, vector<1x8x324xf32>
    %18 = vector.shape_cast %17 : vector<1x8x324xf32> to vector<8x324xf32>
    %19 = vector.shape_cast %16 : vector<8x324xf32> to vector<1x8x324xf32>
    tpu.vector_store %arg7[%c0_16, %c0_17, %c0_18], %19 {strides = array<i32>} : memref<2x8x324xf32, #tpu.memory_space<vmem>>, vector<1x8x324xf32>,
    %c1 = arith.constant 1 : index
    %c0_19 = arith.constant 0 : index
    %c0_20 = arith.constant 0 : index
    %20 = vector.load %arg1[%c1, %c0_19, %c0_20] : memref<2x23x256xf32, #tpu.memory_space<vmem>>, vector<1x23x256xf32>
    %21 = vector.shape_cast %20 : vector<1x23x256xf32> to vector<23x256xf32>
    %cst_21 = arith.constant dense<0.000000e+00> : vector<8x256xf32>
    %22 = tpu.matmul %0, %21, %cst_21 {dimension_numbers = #tpu.dot_dimension_numbers<[1], [0], [0], [1], [0, 0, 1, 1], [], []>} : vector<8x23xf32>, vector<23x256xf32>, vector<8x256xf32> -> vector<8x256xf32>
    %cst_22 = arith.constant dense<0.000000e+00> : vector<8x324xf32>
    %23 = tpu.matmul %22, %1, %cst_22 {dimension_numbers = #tpu.dot_dimension_numbers<[1], [0], [0], [1], [0, 0, 1, 1], [], []>} : vector<8x256xf32>, vector<256x324xf32>, vector<8x324xf32> -> vector<8x324xf32>
    %24 = vector.broadcast %2 : vector<8x1xf32> to vector<8x324xf32>
    %25 = arith.addf %23, %24 : vector<8x324xf32>
    %c1_23 = arith.constant 1 : index
    %c0_24 = arith.constant 0 : index
    %c0_25 = arith.constant 0 : index
    %26 = vector.load %arg5[%c1_23, %c0_24, %c0_25] : memref<2x8x324xf32, #tpu.memory_space<vmem>>, vector<1x8x324xf32>
    %27 = vector.shape_cast %26 : vector<1x8x324xf32> to vector<8x324xf32>
    %cst_26 = arith.constant 2.000000e+00 : f32
    %28 = vector.broadcast %cst_26 : f32 to vector<8x324xf32>
    %29 = arith.mulf %28, %27 : vector<8x324xf32>
    %30 = arith.addf %25, %29 : vector<8x324xf32>
    %c1_27 = arith.constant 1 : index
    %c0_28 = arith.constant 0 : index
    %c0_29 = arith.constant 0 : index
    %31 = vector.load %arg6[%c1_27, %c0_28, %c0_29] : memref<2x8x324xf32, #tpu.memory_space<vmem>>, vector<1x8x324xf32>
    %32 = vector.shape_cast %31 : vector<1x8x324xf32> to vector<8x324xf32>
    %33 = arith.addf %30, %32 : vector<8x324xf32>
    %c1_30 = arith.constant 1 : index
    %c0_31 = arith.constant 0 : index
    %c0_32 = arith.constant 0 : index
    %34 = vector.load %arg7[%c1_30, %c0_31, %c0_32] : memref<2x8x324xf32, #tpu.memory_space<vmem>>, vector<1x8x324xf32>
    %35 = vector.shape_cast %34 : vector<1x8x324xf32> to vector<8x324xf32>
    %36 = vector.shape_cast %33 : vector<8x324xf32> to vector<1x8x324xf32>
    tpu.vector_store %arg7[%c1_30, %c0_31, %c0_32], %36 {strides = array<i32>} : memref<2x8x324xf32, #tpu.memory_space<vmem>>, vector<1x8x324xf32>,
    return
  }
  func.func @transform_0(%arg0: i32) -> (i32, i32, i32) {
    %c0_i32 = arith.constant 0 : i32
    %c0_i32_0 = arith.constant 0 : i32
    %c0_i32_1 = arith.constant 0 : i32
    return %arg0, %c0_i32, %c0_i32_0 : i32, i32, i32
  }
  func.func @transform_1(%arg0: i32) -> (i32, i32) {
    %c0_i32 = arith.constant 0 : i32
    %c0_i32_0 = arith.constant 0 : i32
    %c0_i32_1 = arith.constant 0 : i32
    return %c0_i32, %c0_i32_0 : i32, i32
  }
  func.func @transform_2(%arg0: i32) -> (i32, i32) {
    %c0_i32 = arith.constant 0 : i32
    %c0_i32_0 = arith.constant 0 : i32
    %c0_i32_1 = arith.constant 0 : i32
    return %c0_i32, %c0_i32_0 : i32, i32
  }
  func.func @transform_3(%arg0: i32) -> (i32, i32) {
    %c0_i32 = arith.constant 0 : i32
    %c0_i32_0 = arith.constant 0 : i32
    %c0_i32_1 = arith.constant 0 : i32
    return %c0_i32, %c0_i32_0 : i32, i32
  }
  func.func @transform_4(%arg0: i32) -> (i32, i32, i32) {
    %c0_i32 = arith.constant 0 : i32
    %c0_i32_0 = arith.constant 0 : i32
    %c0_i32_1 = arith.constant 0 : i32
    return %arg0, %c0_i32, %c0_i32_0 : i32, i32, i32
  }
  func.func @transform_5(%arg0: i32) -> (i32, i32, i32) {
    %c0_i32 = arith.constant 0 : i32
    %c0_i32_0 = arith.constant 0 : i32
    %c0_i32_1 = arith.constant 0 : i32
    return %arg0, %c0_i32, %c0_i32_0 : i32, i32, i32
  }
  func.func @transform_6(%arg0: i32) -> (i32, i32, i32) {
    %c0_i32 = arith.constant 0 : i32
    %c0_i32_0 = arith.constant 0 : i32
    %c0_i32_1 = arith.constant 0 : i32
    return %arg0, %c0_i32, %c0_i32_0 : i32, i32, i32
  }
}

</mosaic_0001>

<bundles_post_ra>
// kernel: tpu_custom_call.1
= control target key start
LH: loop header
LB: loop body
LE: loop exit
PB: predicated region body
PF: predicated region fallthrough
CT: control target
= control target key end

     0   :  { %vm132_vm0 = vcmask 1046528   ;;  %v1567_v5 = vmov 0.0   ;;  %vm128_vm1 = vcmask 187392   ;;  %s1560_s0 = inlined_call_operand.vmem [shape: f32[2,23,256], index: 0, kind: input, shape index: {}]   ;;  %s1561_s1 = inlined_call_operand.vmem [shape: f32[8,23], index: 1, kind: input, shape index: {}]   ;;  %s1562_s2 = inlined_call_operand.vmem [shape: f32[8,1], index: 2, kind: input, shape index: {}]   ;;  %s1563_s3 = inlined_call_operand.vmem [shape: f32[256,324], index: 3, kind: input, shape index: {}]   ;;  %s1564_s4 = inlined_call_operand.vmem [shape: f32[2,8,324], index: 4, kind: input, shape index: {}]   ;;  %s1565_s5 = inlined_call_operand.vmem [shape: f32[2,8,324], index: 5, kind: input, shape index: {}]   ;;  %s1566_s6 = inlined_call_operand.hbm [shape: f32[2,8,324], index: 6, kind: output, shape index: {}]  }
   0x1   :  { %v127_v0 = vld [vmem:[%s1560_s0 + $0x28] sm:$0x7f]  ;;  %v126_v1 = vld [vmem:[%s1560_s0 + $0x20] sm:$0x7f]  ;;  %v125_v2 = vld [vmem:[%s1560_s0 + $0x18] sm:$0xff]  ;;  %203 = vmatprep.mubr.f32.mxu1 %v1567_v5 }
   0x2   :  { %637 = vmatprep.subr.msk.mxu1 %vm132_vm0, %v127_v0  ;;  %v124_v3 = vld [vmem:[%s1560_s0 + $0x10] sm:$0xff]  ;;  %v123_v4 = vld [vmem:[%s1560_s0 + $0x8] sm:$0xff]  ;;  %v122_v6 = vld [vmem:[%s1560_s0] sm:$0xff] }
   0x3   :  { %638 = vmatpush1.msk.msra.mxu1 %vm132_vm0, %v126_v1  ;;  %v817_v7 = vld [vmem:[%s1561_s1] sm:$0xff]  ;;  %v822_v8 = vld [vmem:[%s1563_s3 + $0x170] sm:$0xff]  ;;  %v827_v9 = vld [vmem:[%s1563_s3 + $0x168] sm:$0xff] }
   0x4   :  { %167 = vmatprep.subr.mxu1 %v125_v2  ;;  %v832_v10 = vld [vmem:[%s1563_s3 + $0x158] sm:$0xff]  ;;  %v840_v11 = vld [vmem:[%s1563_s3 + $0x150] sm:$0xff]  ;;  %v846_v12 = vld [vmem:[%s1563_s3 + $0x140] sm:$0xff] }
   0x5   :  { %168 = vmatpush1.msra.mxu1 %v124_v3  ;;  %v852_v13 = vld [vmem:[%s1563_s3 + $0x138] sm:$0xff]  ;;  %v858_v14 = vld [vmem:[%s1563_s3 + $0x128] sm:$0xff]  ;;  %v864_v15 = vld [vmem:[%s1563_s3 + $0x120] sm:$0xff] }
   0x6   :  { %169 = vmatprep.subr.mxu1 %v123_v4  ;;  %v870_v16 = vld [vmem:[%s1563_s3 + $0x110] sm:$0xff]  ;;  %v876_v17 = vld [vmem:[%s1563_s3 + $0x108] sm:$0xff]  ;;  %v881_v18 = vld [vmem:[%s1563_s3 + $0x2f8] sm:$0xff] }
   0x7   :  { %170 = vmatpush1.msra.mxu1 %v122_v6  ;;  %v886_v19 = vld [vmem:[%s1563_s3 + $0x178] sm:$0xff]  ;;  %655 = vmatprep.subr.mxu0 %v881_v18  ;;  %v898_v21 = vld [vmem:[%s1563_s3 + $0x2e0] sm:$0xff]  ;;  %v904_v22 = vld [vmem:[%s1563_s3 + $0xf0] sm:$0xff] }
   0x8   :  { %639 = vmatmul.mubr.msk.f32.vlgmr.msra.gmra.mxu1 %vm128_vm1, %v817_v7  ;;  %215 = vmatprep.subr.mxu1 %v822_v8  ;;  %v892_v20 = vld [vmem:[%s1563_s3 + $0xf8] sm:$0xff]  ;;  %v910_v23 = vld [vmem:[%s1563_s3 + $0x160] sm:$0xff]  ;;  %v915_v24 = vld [vmem:[%s1563_s3 + $0x2c8] sm:$0xff] }
   0x9   :  { %216 = vmatpush1.msra.mxu1 %v827_v9  ;;  %656 = vmatpush3.msra.mxu0 %v886_v19  ;;  %v921_v25 = vld [vmem:[%s1563_s3 + $0xe0] sm:$0xff]  ;;  %v927_v26 = vld [vmem:[%s1563_s3 + $0x148] sm:$0xff]  ;;  %v933_v27 = vld [vmem:[%s1563_s3 + $0xd8] sm:$0xff] }
   0xa   :  { %217 = vmatprep.subr.mxu1 %v832_v10  ;;  %657 = vmatprep.subr.mxu0 %v898_v21  ;;  %v939_v28 = vld [vmem:[%s1563_s3 + $0x2b0] sm:$0xff]  ;;  %v945_v29 = vld [vmem:[%s1563_s3 + $0xc8] sm:$0xff]  ;;  %v957_v31 = vld [vmem:[%s1563_s3 + $0xc0] sm:$0xff] }
   0xb   :  { %218 = vmatpush1.msra.mxu1 %v840_v11  ;;  %658 = vmatpush3.msra.mxu0 %v910_v23  ;;  %v951_v30 = vld [vmem:[%s1563_s3 + $0x130] sm:$0xff]  ;;  %v963_v32 = vld [vmem:[%s1563_s3 + $0x298] sm:$0xff]  ;;  %v981_v35 = vld [vmem:[%s1563_s3 + $0xa8] sm:$0xff] }
   0xc   :  { %219 = vmatprep.subr.mxu1 %v846_v12  ;;  %659 = vmatprep.subr.mxu0 %v915_v24  ;;  %v969_v33 = vld [vmem:[%s1563_s3 + $0xb0] sm:$0xff]  ;;  %v975_v34 = vld [vmem:[%s1563_s3 + $0x118] sm:$0xff]  ;;  %v987_v36 = vld [vmem:[%s1563_s3 + $0x280] sm:$0xff] }
   0xd   :  { %220 = vmatpush1.msra.mxu1 %v852_v13  ;;  %660 = vmatpush3.msra.mxu0 %v927_v26  ;;  %v993_v37 = vld [vmem:[%s1563_s3 + $0x98] sm:$0xff]  ;;  %v999_v38 = vld [vmem:[%s1563_s3 + $0x100] sm:$0xff]  ;;  %v1005_v39 = vld [vmem:[%s1563_s3 + $0x90] sm:$0xff] }
   0xe   :  { %221 = vmatprep.subr.mxu1 %v858_v14  ;;  %661 = vmatprep.subr.mxu0 %v939_v28  ;;  %v1011_v40 = vld [vmem:[%s1563_s3 + $0x268] sm:$0xff]  ;;  %v1017_v41 = vld [vmem:[%s1563_s3 + $0x80] sm:$0xff]  ;;  %v1029_v43 = vld [vmem:[%s1563_s3 + $0x78] sm:$0xff] }
   0xf   :  { %222 = vmatpush1.msra.mxu1 %v864_v15  ;;  %662 = vmatpush3.msra.mxu0 %v951_v30  ;;  %v1023_v42 = vld [vmem:[%s1563_s3 + $0xe8] sm:$0xff]  ;;  %v1035_v44 = vld [vmem:[%s1563_s3 + $0x250] sm:$0xff]  ;;  %v1053_v47 = vld [vmem:[%s1563_s3 + $0x60] sm:$0xff] }
  0x10   :  { %223 = vmatprep.subr.mxu1 %v870_v16  ;;  %663 = vmatprep.subr.mxu0 %v963_v32  ;;  %v1041_v45 = vld [vmem:[%s1563_s3 + $0x68] sm:$0xff]  ;;  %v1047_v46 = vld [vmem:[%s1563_s3 + $0xd0] sm:$0xff]  ;;  %v1059_v48 = vld [vmem:[%s1563_s3 + $0x238] sm:$0xff] }
  0x11   :  { %224 = vmatpush1.msra.mxu1 %v876_v17  ;;  %664 = vmatpush3.msra.mxu0 %v975_v34  ;;  %v1065_v49 = vld [vmem:[%s1563_s3 + $0x50] sm:$0xff]  ;;  %v1071_v50 = vld [vmem:[%s1563_s3 + $0xb8] sm:$0xff]  ;;  %v1077_v51 = vld [vmem:[%s1563_s3 + $0x48] sm:$0xff] }
  0x12   :  { %225 = vmatprep.subr.mxu1 %v892_v20  ;;  %665 = vmatprep.subr.mxu0 %v987_v36  ;;  %v1083_v52 = vld [vmem:[%s1563_s3 + $0x220] sm:$0xff]  ;;  %v1089_v53 = vld [vmem:[%s1563_s3 + $0x38] sm:$0xff]  ;;  %v1101_v55 = vld [vmem:[%s1563_s3 + $0x30] sm:$0xff] }
  0x13   :  { %226 = vmatpush1.msra.mxu1 %v904_v22  ;;  %666 = vmatpush3.msra.mxu0 %v999_v38  ;;  %1607 = vst [vmem:[#allocation5_spill] sm:$0xff] %v1089_v53  ;;  %v1095_v54 = vld [vmem:[%s1563_s3 + $0xa0] sm:$0xff]  ;;  %1608 = vst [vmem:[#allocation6_spill] sm:$0xff] %v1101_v55  ;;  %v1107_v56 = vld [vmem:[%s1563_s3 + $0x208] sm:$0xff] }
  0x14   :  { %227 = vmatprep.subr.mxu1 %v921_v25  ;;  %667 = vmatprep.subr.mxu0 %v1011_v40  ;;  %v1113_v57 = vld [vmem:[%s1563_s3 + $0x20] sm:$0xff]  ;;  %v1119_v58 = vld [vmem:[%s1563_s3 + $0x88] sm:$0xff] }
  0x15   :  { %228 = vmatpush1.msra.mxu1 %v933_v27  ;;  %668 = vmatpush3.msra.mxu0 %v1023_v42  ;;  %1609 = vst [vmem:[#allocation7_spill] sm:$0xff] %v1113_v57 }
  0x16   :  { %229 = vmatprep.subr.mxu1 %v945_v29  ;;  %669 = vmatprep.subr.mxu0 %v1035_v44 }
  0x17   :  { %230 = vmatpush1.msra.mxu1 %v957_v31  ;;  %670 = vmatpush3.msra.mxu0 %v1047_v46 }
  0x18   :  { %231 = vmatprep.subr.mxu1 %v969_v33  ;;  %671 = vmatprep.subr.mxu0 %v1059_v48 }
  0x19   :  { %232 = vmatpush1.msra.mxu1 %v981_v35  ;;  %672 = vmatpush3.msra.mxu0 %v1071_v50 }
  0x1a   :  { %233 = vmatprep.subr.mxu1 %v993_v37  ;;  %673 = vmatprep.subr.mxu0 %v1083_v52 }
  0x1b   :  { %234 = vmatpush1.msra.mxu1 %v1005_v39 }
  0x1c   :  { %235 = vmatprep.subr.mxu1 %v1017_v41 }
  0x1d   :  { %236 = vmatpush1.msra.mxu1 %v1029_v43 }
  0x1e   :  { %237 = vmatprep.subr.mxu1 %v1041_v45 }
  0x1f   :  { %238 = vmatpush1.msra.mxu1 %v1053_v47 }
  0x20   :  { %239 = vmatprep.subr.mxu1 %v1065_v49 }
  0x21   :  { %240 = vmatpush1.msra.mxu1 %v1077_v51 }
  0x22   :  { %11 = vsyncpa [#allocation3], 0  ;;  %241 = vmatprep.subr.mxu1 %v1089_v53  ;;  %v1125_v59 = vld [vmem:[%s1563_s3 + $0x18] sm:$0xff]  ;;  %674 = vmatpush3.msra.mxu0 %v1095_v54  ;;  %v1131_v60 = vld [vmem:[%s1563_s3 + $0x1f0] sm:$0xff]  ;;  %vm373_vm2 = vcmask 556032  }
  0x23   :  { %1610 = vst [vmem:[#allocation8_spill] sm:$0xff] %v1125_v59  ;;  %242 = vmatpush1.msra.mxu1 %v1101_v55  ;;  %v1137_v61 = vld [vmem:[%s1563_s3 + $0x8] sm:$0xff]  ;;  %675 = vmatprep.subr.mxu0 %v1107_v56  ;;  %v1143_v62 = vld [vmem:[%s1563_s3 + $0x70] sm:$0xff]  ;;  %v1149_v63 = vld [vmem:[%s1563_s3] sm:$0xff] }
  0x24   :  { %1611 = vst [vmem:[#allocation9_spill] sm:$0xff] %v1137_v61  ;;  %243 = vmatprep.subr.mxu1 %v1113_v57  ;;  %1612 = vst [vmem:[#allocation10_spill] sm:$0xff] %v1149_v63  ;;  %676 = vmatpush3.msra.mxu0 %v1119_v58  ;;  %v1155_v0 = vld [vmem:[%s1563_s3 + $0x1d8] sm:$0xff]  ;;  %v1161_v1 = vld [vmem:[%s1563_s3 + $0x2f0] sm:$0xff] }
  0x25   :  { %244 = vmatpush1.msra.mxu1 %v1125_v59  ;;  %1613 = vst [vmem:[#allocation11_spill] sm:$0xff] %v1161_v1  ;;  %677 = vmatprep.subr.mxu0 %v1131_v60  ;;  %v1167_v2 = vld [vmem:[%s1563_s3 + $0x58] sm:$0xff]  ;;  %v1173_v3 = vld [vmem:[%s1563_s3 + $0x2e8] sm:$0xff]  ;;  %v1179_v4 = vld [vmem:[%s1563_s3 + $0x1c0] sm:$0xff] }
  0x26   :  { %245 = vmatprep.subr.mxu1 %v1137_v61  ;;  %1614 = vst [vmem:[#allocation12_spill] sm:$0xff] %v1173_v3  ;;  %678 = vmatpush3.msra.mxu0 %v1143_v62  ;;  %v1185_v6 = vld [vmem:[%s1563_s3 + $0x2d8] sm:$0xff]  ;;  %v1191_v5 = vld [vmem:[%s1563_s3 + $0x40] sm:$0xff]  ;;  %v1197_v61 = vld [vmem:[%s1563_s3 + $0x2d0] sm:$0xff] }
  0x27   :  { %246 = vmatpush1.msra.mxu1 %v1149_v63  ;;  %1615 = vst [vmem:[#allocation13_spill] sm:$0xff] %v1185_v6  ;;  %679 = vmatprep.subr.mxu0 %v1155_v0  ;;  %1616 = vst [vmem:[#allocation14_spill] sm:$0xff] %v1197_v61  ;;  %v1203_v63 = vld [vmem:[%s1563_s3 + $0x1a8] sm:$0xff]  ;;  %v1209_v59 = vld [vmem:[%s1563_s3 + $0x2c0] sm:$0xff] }
  0x28   :  { %247 = vmatprep.subr.mxu1 %v1161_v1  ;;  %680 = vmatpush3.msra.mxu0 %v1167_v2  ;;  %1617 = vst [vmem:[#allocation15_spill] sm:$0xff] %v1209_v59  ;;  %v1216_v1 = vld [vmem:[%s1563_s3 + $0x2b8] sm:$0xff]  ;;  %v1242_v57 = vld [vmem:[%s1563_s3 + $0x288] sm:$0xff]  ;;  %v644_v53 = vld [vmem:[%s1560_s0 + $0x50] sm:$0x7f] }
  0x29   :  { %248 = vmatpush2.msra.mxu1 %v1173_v3  ;;  %681 = vmatprep.subr.mxu0 %v1179_v4  ;;  %1618 = vst [vmem:[#allocation16_spill] sm:$0xff] %v1216_v1  ;;  %v1223_v3 = vld [vmem:[%s1563_s3 + $0x2a8] sm:$0xff]  ;;  %1622 = vst [vmem:[#allocation20_spill] sm:$0xff] %v1242_v57 }
  0x2a   :  { %249 = vmatprep.subr.mxu1 %v1185_v6  ;;  %682 = vmatpush3.msra.mxu0 %v1191_v5  ;;  %1619 = vst [vmem:[#allocation17_spill] sm:$0xff] %v1223_v3  ;;  %v1230_v6 = vld [vmem:[%s1563_s3 + $0x2a0] sm:$0xff] }
  0x2b   :  { %250 = vmatpush2.msra.mxu1 %v1197_v61  ;;  %683 = vmatprep.subr.mxu0 %v1203_v63  ;;  %1620 = vst [vmem:[#allocation18_spill] sm:$0xff] %v1230_v6  ;;  %v1236_v61 = vld [vmem:[%s1563_s3 + $0x290] sm:$0xff] }
  0x2c   :  { %251 = vmatprep.subr.mxu1 %v1209_v59  ;;  %1621 = vst [vmem:[#allocation19_spill] sm:$0xff] %v1236_v61  ;;  %v1248_v59 = vld [vmem:[%s1563_s3 + $0x278] sm:$0xff] }
  0x2d   :  { %252 = vmatpush2.msra.mxu1 %v1216_v1  ;;  %1623 = vst [vmem:[#allocation21_spill] sm:$0xff] %v1248_v59  ;;  %v1254_v1 = vld [vmem:[%s1563_s3 + $0x270] sm:$0xff] }
  0x2e   :  { %253 = vmatprep.subr.mxu1 %v1223_v3  ;;  %1624 = vst [vmem:[#allocation22_spill] sm:$0xff] %v1254_v1  ;;  %v1260_v3 = vld [vmem:[%s1563_s3 + $0x260] sm:$0xff] }
  0x2f   :  { %254 = vmatpush2.msra.mxu1 %v1230_v6  ;;  %1625 = vst [vmem:[#allocation23_spill] sm:$0xff] %v1260_v3  ;;  %v1266_v6 = vld [vmem:[%s1563_s3 + $0x258] sm:$0xff] }
  0x30   :  { %255 = vmatprep.subr.mxu1 %v1236_v61  ;;  %1626 = vst [vmem:[#allocation24_spill] sm:$0xff] %v1266_v6  ;;  %v1272_v61 = vld [vmem:[%s1563_s3 + $0x248] sm:$0xff] }
  0x31   :  { %256 = vmatpush2.msra.mxu1 %v1242_v57  ;;  %1627 = vst [vmem:[#allocation25_spill] sm:$0xff] %v1272_v61  ;;  %v1278_v57 = vld [vmem:[%s1563_s3 + $0x240] sm:$0xff] }
  0x32   :  { %257 = vmatprep.subr.mxu1 %v1248_v59  ;;  %1628 = vst [vmem:[#allocation26_spill] sm:$0xff] %v1278_v57  ;;  %v1284_v59 = vld [vmem:[%s1563_s3 + $0x230] sm:$0xff] }
  0x33   :  { %258 = vmatpush2.msra.mxu1 %v1254_v1  ;;  %1629 = vst [vmem:[#allocation27_spill] sm:$0xff] %v1284_v59  ;;  %v1290_v1 = vld [vmem:[%s1563_s3 + $0x228] sm:$0xff] }
  0x34   :  { %259 = vmatprep.subr.mxu1 %v1260_v3  ;;  %1630 = vst [vmem:[#allocation28_spill] sm:$0xff] %v1290_v1  ;;  %v1296_v3 = vld [vmem:[%s1563_s3 + $0x218] sm:$0xff] }
  0x35   :  { %260 = vmatpush2.msra.mxu1 %v1266_v6  ;;  %1631 = vst [vmem:[#allocation29_spill] sm:$0xff] %v1296_v3  ;;  %v1302_v6 = vld [vmem:[%s1563_s3 + $0x210] sm:$0xff] }
  0x36   :  { %261 = vmatprep.subr.mxu1 %v1272_v61  ;;  %1632 = vst [vmem:[#allocation30_spill] sm:$0xff] %v1302_v6  ;;  %v1308_v61 = vld [vmem:[%s1563_s3 + $0x200] sm:$0xff] }
  0x37   :  { %262 = vmatpush2.msra.mxu1 %v1278_v57  ;;  %1633 = vst [vmem:[#allocation31_spill] sm:$0xff] %v1308_v61  ;;  %v1314_v57 = vld [vmem:[%s1563_s3 + $0x1f8] sm:$0xff] }
  0x38   :  { %263 = vmatprep.subr.mxu1 %v1284_v59  ;;  %1634 = vst [vmem:[#allocation32_spill] sm:$0xff] %v1314_v57  ;;  %v1320_v59 = vld [vmem:[%s1563_s3 + $0x1e8] sm:$0xff] }
  0x39   :  { %264 = vmatpush2.msra.mxu1 %v1290_v1  ;;  %1635 = vst [vmem:[#allocation33_spill] sm:$0xff] %v1320_v59  ;;  %v1326_v1 = vld [vmem:[%s1563_s3 + $0x1e0] sm:$0xff] }
  0x3a   :  { %265 = vmatprep.subr.mxu1 %v1296_v3  ;;  %1636 = vst [vmem:[#allocation34_spill] sm:$0xff] %v1326_v1  ;;  %v1332_v3 = vld [vmem:[%s1563_s3 + $0x1d0] sm:$0xff] }
  0x3b   :  { %266 = vmatpush2.msra.mxu1 %v1302_v6  ;;  %1637 = vst [vmem:[#allocation35_spill] sm:$0xff] %v1332_v3  ;;  %v1338_v6 = vld [vmem:[%s1563_s3 + $0x1c8] sm:$0xff] }
  0x3c   :  { %267 = vmatprep.subr.mxu1 %v1308_v61  ;;  %1638 = vst [vmem:[#allocation36_spill] sm:$0xff] %v1338_v6  ;;  %v1344_v61 = vld [vmem:[%s1563_s3 + $0x1b8] sm:$0xff] }
  0x3d   :  { %268 = vmatpush2.msra.mxu1 %v1314_v57  ;;  %1639 = vst [vmem:[#allocation37_spill] sm:$0xff] %v1344_v61  ;;  %v1350_v57 = vld [vmem:[%s1563_s3 + $0x1b0] sm:$0xff] }
  0x3e   :  { %269 = vmatprep.subr.mxu1 %v1320_v59  ;;  %1640 = vst [vmem:[#allocation38_spill] sm:$0xff] %v1350_v57  ;;  %v645_v59 = vld [vmem:[%s1560_s0 + $0x58] sm:$0x7f] }
  0x3f   :  { %270 = vmatpush2.msra.mxu1 %v1326_v1  ;;  %v1358_v1 = vld [vmem:[%s1563_s3 + $0x1a0] sm:$0xff] }
  0x40   :  { %271 = vmatprep.subr.mxu1 %v1332_v3  ;;  %1641 = vst [vmem:[#allocation39_spill] sm:$0xff] %v1358_v1  ;;  %v1363_v3 = vld [vmem:[%s1563_s3 + $0x28] sm:$0xff] }
  0x41   :  { %272 = vmatpush2.msra.mxu1 %v1338_v6  ;;  %684 = vmatpush3.msra.mxu0 %v1363_v3  ;;  %v1387_v6 = vld [vmem:[%s1563_s3 + $0x10] sm:$0xff] }
  0x42   :  { %273 = vmatprep.subr.mxu1 %v1344_v61  ;;  %v1370_v61 = vld [vmem:[%s1563_s3 + $0x198] sm:$0xff]  ;;  %1645 = vst [vmem:[#allocation43_spill] sm:$0xff] %v1387_v6 }
  0x43   :  { %274 = vmatpush2.msra.mxu1 %v1350_v57  ;;  %1642 = vst [vmem:[#allocation40_spill] sm:$0xff] %v1370_v61  ;;  %v1375_v57 = vld [vmem:[%s1563_s3 + $0x190] sm:$0xff] }
  0x44   :  { %275 = vmatprep.subr.mxu1 %v1358_v1  ;;  %1643 = vst [vmem:[#allocation41_spill] sm:$0xff] %v1375_v57  ;;  %685 = vmatprep.subr.mxu0 %v1375_v57  ;;  %v1382_v1 = vld [vmem:[%s1563_s3 + $0x188] sm:$0xff] }
  0x45   :  { %276 = vmatpush2.msra.mxu1 %v1370_v61  ;;  %1644 = vst [vmem:[#allocation42_spill] sm:$0xff] %v1382_v1  ;;  %686 = vmatpush3.msra.mxu0 %v1387_v6  ;;  %v1394_v61 = vld [vmem:[%s1563_s3 + $0x180] sm:$0xff]  ;;  %v754_v6 = vmov 0  }
  0x46   :  { %277 = vmatprep.subr.mxu1 %v1382_v1  ;;  %646 = vmatprep.subr.msk.mxu0 %vm132_vm0, %v645_v59  ;;  %v121_v1 = vld [vmem:[%s1562_s2] sm:$0xff]  ;;  %v643_v59 = vld [vmem:[%s1560_s0 + $0x48] sm:$0xff] }
  0x47   :  { %278 = vmatpush2.msra.mxu1 %v1394_v61  ;;  %730 = vset.pattern.permute.xlu0 %v754_v6  ;;  %v1646_v6 = vmov 0.0  }
  0x48   :  { %690 = vmatprep.subr.mxu1 %v881_v18  ;;  %212 = vperm.xlu0 %730, %v121_v1   ;;  %v642_v18 = vld [vmem:[%s1560_s0 + $0x40] sm:$0xff]  ;;  %v641_v1 = vld [vmem:[%s1560_s0 + $0x38] sm:$0xff] }
  0xc8   :  { %v205_v55 = vpop.f32.mrf.mxu1 }
  0xca   :  { %v207_v57 = vpop.f32.mrf.mxu1 }
  0xcb   :  { %279 = vmatprep.mubr.f32.mxu1 %v207_v57  ;;  %350 = vmatprep.mubr.f32.mxu0 %v207_v57  ;;  %v640_v57 = vld [vmem:[%s1560_s0 + $0x30] sm:$0xff] }
  0xcc   :  { %280 = vmatmul.mubr.f32.vlgmr.msra.gmra.mxu1 %v205_v55  ;;  %351 = vmatmul.mubr.f32.vlgmr.msra.gmra.mxu0 %v205_v55  ;;  %v365_v55 = vld [vmem:[%s1565_s5] sm:$0xff] }
  0xcd   :  { %647 = vmatpush1.msk.msra.mxu0 %vm132_vm0, %v644_v53  ;;  %452 = vmatprep.mubr.f32.mxu0 %v1646_v6 }
  0xce   :  { %416 = vmatprep.subr.mxu0 %v643_v59  ;;  %691 = vmatpush3.msra.mxu1 %v886_v19  ;;  %v1659_v19 = vld [vmem:[#allocation15_spill] sm:$0xff]  ;;  %v367_v59 = vld [vmem:[%s1565_s5 + $0x10] sm:$0xff] }
  0xcf   :  { %417 = vmatpush1.msra.mxu0 %v642_v18  ;;  %692 = vmatprep.subr.mxu1 %v898_v21  ;;  %v1661_v21 = vld [vmem:[#allocation17_spill] sm:$0xff] }
  0xd0   :  { %418 = vmatprep.subr.mxu0 %v641_v1  ;;  %693 = vmatpush3.msra.mxu1 %v910_v23  ;;  %v1663_v23 = vld [vmem:[#allocation19_spill] sm:$0xff] }
  0xd1   :  { %419 = vmatpush1.msra.mxu0 %v640_v57  ;;  %694 = vmatprep.subr.mxu1 %v915_v24  ;;  %v1664_v24 = vld [vmem:[#allocation20_spill] sm:$0xff] }
  0xd2   :  { %648 = vmatmul.mubr.msk.f32.vlgmr.msra.gmra.mxu0 %vm128_vm1, %v817_v7  ;;  %459 = vmatprep.subr.mxu0 %v822_v8  ;;  %v1647_v7 = vld [vmem:[#allocation5_spill] sm:$0xff] }
  0xd3   :  { %460 = vmatpush1.msra.mxu0 %v827_v9  ;;  %695 = vmatpush3.msra.mxu1 %v927_v26  ;;  %v1648_v8 = vld [vmem:[#allocation41_spill] sm:$0xff]  ;;  %v1649_v9 = vld [vmem:[#allocation6_spill] sm:$0xff] }
  0xd4   :  { %461 = vmatprep.subr.mxu0 %v832_v10  ;;  %696 = vmatprep.subr.mxu1 %v939_v28  ;;  %v1650_v10 = vld [vmem:[#allocation43_spill] sm:$0xff]  ;;  %v1666_v26 = vld [vmem:[#allocation22_spill] sm:$0xff]  ;;  %v1668_v28 = vld [vmem:[#allocation24_spill] sm:$0xff] }
  0xd5   :  { %462 = vmatpush1.msra.mxu0 %v840_v11  ;;  %697 = vmatpush3.msra.mxu1 %v951_v30  ;;  %v1651_v11 = vld [vmem:[#allocation7_spill] sm:$0xff]  ;;  %v1670_v30 = vld [vmem:[#allocation26_spill] sm:$0xff] }
  0xd6   :  { %463 = vmatprep.subr.mxu0 %v846_v12  ;;  %698 = vmatprep.subr.mxu1 %v963_v32  ;;  %v1652_v12 = vld [vmem:[#allocation8_spill] sm:$0xff] }
  0xd7   :  { %464 = vmatpush1.msra.mxu0 %v852_v13  ;;  %699 = vmatpush3.msra.mxu1 %v975_v34  ;;  %v1654_v13 = vld [vmem:[#allocation10_spill] sm:$0xff]  ;;  %v1672_v32 = vld [vmem:[#allocation28_spill] sm:$0xff] }
  0xd8   :  { %465 = vmatprep.subr.mxu0 %v858_v14  ;;  %700 = vmatprep.subr.mxu1 %v987_v36  ;;  %v1655_v14 = vld [vmem:[#allocation11_spill] sm:$0xff]  ;;  %v1674_v34 = vld [vmem:[#allocation30_spill] sm:$0xff]  ;;  %v1676_v36 = vld [vmem:[#allocation32_spill] sm:$0xff] }
  0xd9   :  { %466 = vmatpush1.msra.mxu0 %v864_v15  ;;  %701 = vmatpush3.msra.mxu1 %v999_v38  ;;  %v1656_v15 = vld [vmem:[#allocation12_spill] sm:$0xff]  ;;  %v1678_v38 = vld [vmem:[#allocation34_spill] sm:$0xff] }
  0xda   :  { %467 = vmatprep.subr.mxu0 %v870_v16  ;;  %702 = vmatprep.subr.mxu1 %v1011_v40  ;;  %v1657_v16 = vld [vmem:[#allocation13_spill] sm:$0xff]  ;;  %v1680_v40 = vld [vmem:[#allocation36_spill] sm:$0xff] }
  0xdb   :  { %468 = vmatpush1.msra.mxu0 %v876_v17  ;;  %703 = vmatpush3.msra.mxu1 %v1023_v42  ;;  %v1658_v17 = vld [vmem:[#allocation14_spill] sm:$0xff] }
  0xdc   :  { %469 = vmatprep.subr.mxu0 %v892_v20  ;;  %704 = vmatprep.subr.mxu1 %v1035_v44  ;;  %v1660_v20 = vld [vmem:[#allocation16_spill] sm:$0xff]  ;;  %v1682_v42 = vld [vmem:[#allocation38_spill] sm:$0xff] }
  0xdd   :  { %470 = vmatpush1.msra.mxu0 %v904_v22  ;;  %705 = vmatpush3.msra.mxu1 %v1047_v46  ;;  %v1662_v22 = vld [vmem:[#allocation18_spill] sm:$0xff]  ;;  %v1684_v44 = vld [vmem:[#allocation40_spill] sm:$0xff]  ;;  %v356_v46 = vld [vmem:[%s1564_s4] sm:$0xff] }
  0xde   :  { %471 = vmatprep.subr.mxu0 %v921_v25  ;;  %706 = vmatprep.subr.mxu1 %v1059_v48  ;;  %v1665_v25 = vld [vmem:[#allocation21_spill] sm:$0xff]  ;;  %v357_v48 = vld [vmem:[%s1564_s4 + $0x8] sm:$0xff] }
  0xdf   :  { %472 = vmatpush1.msra.mxu0 %v933_v27  ;;  %707 = vmatpush3.msra.mxu1 %v1071_v50  ;;  %v1667_v27 = vld [vmem:[#allocation23_spill] sm:$0xff] }
  0xe0   :  { %473 = vmatprep.subr.mxu0 %v945_v29  ;;  %708 = vmatprep.subr.mxu1 %v1083_v52  ;;  %v1669_v29 = vld [vmem:[#allocation25_spill] sm:$0xff] }
  0xe1   :  { %474 = vmatpush1.msra.mxu0 %v957_v31  ;;  %709 = vmatpush3.msra.mxu1 %v1095_v54  ;;  %v1671_v31 = vld [vmem:[#allocation27_spill] sm:$0xff]  ;;  %v358_v52 = vld [vmem:[%s1564_s4 + $0x10] sm:$0xff]  ;;  %v360_v54 = vmul.f32 2.0, %v357_v48 }
  0xe2   :  { %475 = vmatprep.subr.mxu0 %v969_v33  ;;  %710 = vmatprep.subr.mxu1 %v1107_v56  ;;  %v1673_v33 = vld [vmem:[#allocation29_spill] sm:$0xff] }
  0xe3   :  { %476 = vmatpush1.msra.mxu0 %v981_v35  ;;  %711 = vmatpush3.msra.mxu1 %v1119_v58  ;;  %v1675_v35 = vld [vmem:[#allocation31_spill] sm:$0xff] }
  0xe4   :  { %477 = vmatprep.subr.mxu0 %v993_v37  ;;  %712 = vmatprep.subr.mxu1 %v1131_v60  ;;  %v1677_v37 = vld [vmem:[#allocation33_spill] sm:$0xff] }
  0xe5   :  { %478 = vmatpush1.msra.mxu0 %v1005_v39  ;;  %713 = vmatpush3.msra.mxu1 %v1143_v62  ;;  %v1679_v39 = vld [vmem:[#allocation35_spill] sm:$0xff] }
  0xe6   :  { %479 = vmatprep.subr.mxu0 %v1017_v41  ;;  %714 = vmatprep.subr.mxu1 %v1155_v0  ;;  %v1681_v41 = vld [vmem:[#allocation37_spill] sm:$0xff]  ;;  %v366_v0 = vld [vmem:[%s1565_s5 + $0x8] sm:$0xff] }
  0xe7   :  { %480 = vmatpush1.msra.mxu0 %v1029_v43  ;;  %715 = vmatpush3.msra.mxu1 %v1167_v2  ;;  %v1683_v43 = vld [vmem:[#allocation39_spill] sm:$0xff] }
  0xe8   :  { %481 = vmatprep.subr.mxu0 %v1041_v45  ;;  %716 = vmatprep.subr.mxu1 %v1179_v4  ;;  %v1685_v45 = vld [vmem:[#allocation42_spill] sm:$0xff] }
  0xe9   :  { %482 = vmatpush1.msra.mxu0 %v1053_v47  ;;  %717 = vmatpush3.msra.mxu1 %v1191_v5  ;;  %v1653_v5 = vld [vmem:[#allocation9_spill] sm:$0xff]  ;;  %v213_v47 = vpop.permute.xlu0 %212 }
  0xea   :  { %483 = vmatprep.subr.mxu0 %v1065_v49  ;;  %718 = vmatprep.subr.mxu1 %v1203_v63  ;;  %v359_v49 = vmul.f32 2.0, %v356_v46  ;;  %v361_v63 = vmul.f32 2.0, %v358_v52 }
  0xeb   :  { %484 = vmatpush1.msra.mxu0 %v1077_v51  ;;  %719 = vmatpush3.msra.mxu1 %v1363_v3 }
  0xec   :  { %485 = vmatprep.subr.mxu0 %v1647_v7  ;;  %720 = vmatprep.subr.mxu1 %v1648_v8  ;;  %v649_v8 = vld [vmem:[%s1564_s4 + $0x18] sm:$0xff] }
  0xed   :  { %486 = vmatpush1.msra.mxu0 %v1649_v9  ;;  %721 = vmatpush3.msra.mxu1 %v1650_v10  ;;  %v650_v9 = vld [vmem:[%s1564_s4 + $0x20] sm:$0xff]  ;;  %v604_v10 = vmul.f32 2.0, %v649_v8 }
  0xee   :  { %487 = vmatprep.subr.mxu0 %v1651_v11 }
  0xef   :  { %488 = vmatpush1.msra.mxu0 %v1652_v12 }
  0xf0   :  { %489 = vmatprep.subr.mxu0 %v1653_v5  ;;  %v651_v5 = vld [vmem:[%s1564_s4 + $0x28] sm:$0xff]  ;;  %s755_s4 = smov [#allocation2]  }
  0xf1   :  { %490 = vmatpush1.msra.mxu0 %v1654_v13  ;;  %s626_s10 = sshll.u32 %s755_s4, 4  ;;  %s627_s10 = int_to_ptr.vmem [resolvable:$true] %s626_s10 }
  0xf2   :  { %491 = vmatprep.subr.mxu0 %v1655_v14  ;;  %v605_v14 = vmul.f32 2.0, %v650_v9  ;;  %s731_s12 = scalar_lea.vmem %s627_s10, 768  ;;  %p736_p1 = scmp.lt.s32.totalorder %s627_s10, %s627_s10 }
  0xf3   :  { %492 = vmatpush2.msra.mxu0 %v1656_v15  ;;  %v652_v15 = vld [vmem:[%s1565_s5 + $0x18] sm:$0xff]  ;;  %p732_p0 = scmp.ne.s32.totalorder %s627_s10, %s731_s12  ;;  %p737_p2 = scmp.lt.s32.totalorder %s731_s12, %s731_s12 }
  0xf4   :  { %493 = vmatprep.subr.mxu0 %v1657_v16 }
  0xf5   :  { %494 = vmatpush2.msra.mxu0 %v1658_v17  ;;  %p738_p3 = por %p737_p2, %p736_p1 }
  0xf6   :  { %495 = vmatprep.subr.mxu0 %v1659_v19 }
  0xf7   :  { %496 = vmatpush2.msra.mxu0 %v1660_v20  ;;  %p739_p4 = pnand %p738_p3, %p732_p0 }
  0xf8   :  { %497 = vmatprep.subr.mxu0 %v1661_v21 }
  0xf9   :  { %498 = vmatpush2.msra.mxu0 %v1662_v22  ;;  %v606_v22 = vmul.f32 2.0, %v651_v5 }
  0xfa   :  { %499 = vmatprep.subr.mxu0 %v1663_v23  ;;  %v653_v23 = vld [vmem:[%s1565_s5 + $0x20] sm:$0xff] }
  0xfb   :  { %500 = vmatpush2.msra.mxu0 %v1664_v24 }
  0xfc   :  { %501 = vmatprep.subr.mxu0 %v1665_v25 }
  0xfd   :  { %502 = vmatpush2.msra.mxu0 %v1666_v26 }
  0xfe   :  { %503 = vmatprep.subr.mxu0 %v1667_v27  ;;  %v654_v27 = vld [vmem:[%s1565_s5 + $0x28] sm:$0xff] }
  0xff   :  { %504 = vmatpush2.msra.mxu0 %v1668_v28 }
 0x100   :  { %505 = vmatprep.subr.mxu0 %v1669_v29 }
 0x101   :  { %506 = vmatpush2.msra.mxu0 %v1670_v30 }
 0x102   :  { %507 = vmatprep.subr.mxu0 %v1671_v31 }
 0x103   :  { %508 = vmatpush2.msra.mxu0 %v1672_v32 }
 0x104   :  { %509 = vmatprep.subr.mxu0 %v1673_v33 }
 0x105   :  { %510 = vmatpush2.msra.mxu0 %v1674_v34 }
 0x106   :  { %511 = vmatprep.subr.mxu0 %v1675_v35 }
 0x107   :  { %512 = vmatpush2.msra.mxu0 %v1676_v36 }
 0x108   :  { %513 = vmatprep.subr.mxu0 %v1677_v37 }
 0x109   :  { %514 = vmatpush2.msra.mxu0 %v1678_v38 }
 0x10a   :  { %515 = vmatprep.subr.mxu0 %v1679_v39 }
 0x10b   :  { %516 = vmatpush2.msra.mxu0 %v1680_v40 }
 0x10c   :  { %517 = vmatprep.subr.mxu0 %v1681_v41 }
 0x10d   :  { %518 = vmatpush2.msra.mxu0 %v1682_v42 }
 0x10e   :  { %519 = vmatprep.subr.mxu0 %v1683_v43 }
 0x10f   :  { %520 = vmatpush2.msra.mxu0 %v1684_v44 }
 0x110   :  { %521 = vmatprep.subr.mxu0 %v1685_v45 }
 0x111   :  { %522 = vmatpush2.msra.mxu0 %v1394_v61 }
 0x18c   :  { %v281_v50 = vpop.f32.mrf.mxu1  ;;  %v687_v51 = vpop.f32.mrf.mxu0 }
 0x18d   :  { %v282_v53 = vadd.f32 %v281_v50, %v213_v47 }
 0x18e   :  { %v283_v56 = vpop.f32.mrf.mxu1  ;;  %v688_v58 = vpop.f32.mrf.mxu0 }
 0x18f   :  { %v362_v60 = vadd.f32 %v359_v49, %v282_v53  ;;  %v284_v61 = vadd.f32 %v283_v56, %v213_v47  ;;  %v689_v62 = vadd.f32 %v688_v58, %v687_v51 }
 0x191   :  { %v368_v2 = vadd.f32 %v365_v55, %v362_v60  ;;  %v363_v3 = vadd.f32 %v360_v54, %v284_v61  ;;  %v353_v4 = vadd.f32 %v689_v62, %v213_v47 }
 0x192   :  { %v454_v18 = vpop.f32.mrf.mxu0 }
 0x193   :  { %371 = vst [vmem:[#allocation2] sm:$0xff] %v368_v2  ;;  %v369_v1 = vadd.f32 %v366_v0, %v363_v3  ;;  %v364_v6 = vadd.f32 %v361_v63, %v353_v4 }
 0x194   :  { %v456_v57 = vpop.f32.mrf.mxu0 }
 0x195   :  { %372 = vst [vmem:[#allocation2 + $0x8] sm:$0xff] %v369_v1  ;;  %v370_v7 = vadd.f32 %v367_v59, %v364_v6  ;;  %523 = vmatprep.mubr.f32.mxu0 %v456_v57  ;;  %594 = vmatprep.mubr.f32.mxu1 %v456_v57 }
 0x196   :  { %524 = vmatmul.mubr.f32.vlgmr.msra.gmra.mxu0 %v454_v18  ;;  %595 = vmatmul.mubr.f32.vlgmr.msra.gmra.mxu1 %v454_v18 }
 0x197   :  { %374 = vst.msk [vmem:[#allocation2 + $0x10] sm:$0xff] %vm373_vm2, %v370_v7 }
 0x256   :  { %v525_v11 = vpop.f32.mrf.mxu0  ;;  %v722_v12 = vpop.f32.mrf.mxu1 }
 0x257   :  { %v526_v13 = vadd.f32 %v525_v11, %v213_v47 }
 0x258   :  { %v527_v16 = vpop.f32.mrf.mxu0  ;;  %v723_v17 = vpop.f32.mrf.mxu1 }
 0x259   :  { %v607_v19 = vadd.f32 %v604_v10, %v526_v13  ;;  %v528_v20 = vadd.f32 %v527_v16, %v213_v47  ;;  %v724_v21 = vadd.f32 %v723_v17, %v722_v12 }
 0x25b   :  { %v614_v24 = vadd.f32 %v652_v15, %v607_v19  ;;  %v608_v25 = vadd.f32 %v605_v14, %v528_v20  ;;  %v597_v26 = vadd.f32 %v724_v21, %v213_v47 }
 0x25d   :  { %618 = vst [vmem:[#allocation2 + $0x18] sm:$0xff] %v614_v24  ;;  %v615_v28 = vadd.f32 %v653_v23, %v608_v25  ;;  %v609_v29 = vadd.f32 %v606_v22, %v597_v26 }
 0x25f   :  { %619 = vst [vmem:[#allocation2 + $0x20] sm:$0xff] %v615_v28  ;;  %v616_v30 = vadd.f32 %v654_v27, %v609_v29 }
 0x261   :  { %620 = vst.msk [vmem:[#allocation2 + $0x28] sm:$0xff] %vm373_vm2, %v616_v30 }
 0x262   :  { %742 = shalt.err (!%p739_p4)
}
 0x263   :  { %s756_s13 = smov 384   ;;  %s757_s14 = smov 24  }
 0x264   :  { %632 = dma.vmem_to_hbm [thread:$0]  %s627_s10, 768, %s1566_s6, [#allocation3], %s756_s13, %s756_s13, %s757_s14  }
 0x265   :  { %751 = dma.done.wait [#allocation3], 768  }
 0x266   :  { %752 = vsyncadd [#allocation3], 4294966528 }
 0x267   :  { %636 = vsyncpa [#allocation3], 1 }

</bundles_post_ra>
